<compile_context>
chip_gen: v5e
topology: v5e:2x2
jax: 0.10.0
libtpu: 0.0.40
codegen_flags: <defaults>
</compile_context>

<pallas_src>
import jax
import jax.numpy as jnp
from jax.experimental import pallas as pl
from jax.experimental.pallas import tpu as pltpu

LANE = 128   # TPU lane width
H1 = 128     # first hidden width (already lane-dense)
H2 = 64      # second hidden width (logical, PyTorch)
H2P = 128    # second hidden width padded to lane width


def _round_up(x, m):
    return (x + m - 1) // m * m


def _choose_batch_tiling(batch, target_tb=2048):
    """Pick (batch tile rows, grid length).

    * tiles up to `target_tb` rows for large batches (per-step overhead
      amortization / HBM-roofline regime),
    * >= 2 tiles once there's real work so v7x's two TensorCores each get one,
    * tile rows a multiple of 16 (bf16 output sublane packing; 8 suffices only
      when the whole batch is a single sub-16 tile).
    """
    g = 16 if batch > 8 else 8
    n_tiles = max(pl.cdiv(batch, target_tb), 2 if batch >= 512 else 1)
    tb = _round_up(pl.cdiv(batch, n_tiles), g)
    return tb, pl.cdiv(batch, tb)


def chatbot_mlp_kernel(x_ref, w1_ref, b1_ref, w2_ref, b2_ref, w3_ref, b3_ref,
                       o_ref):
    """Fused 3-layer MLP on one (tb, din) batch tile.

    Weights are bf16 (MXU fast path); all accumulation and the bias+ReLU
    epilogue stay in f32 (safe on v5e's non-bf16 VPU as well). The unpadded
    f32 x tile is cast to bf16 in-kernel."""
    x = x_ref[...].astype(jnp.bfloat16)          # (tb, din)

    # Layer 1: (tb, din) @ (din, 128) -> f32 acc -> +bias -> ReLU
    h1 = jnp.dot(x, w1_ref[...], preferred_element_type=jnp.float32)
    h1 = jnp.maximum(h1 + b1_ref[...], 0.0)
    # dropout(p=0.5): eval-mode identity.

    # Layer 2: (tb, 128) @ (128, 128-padded); padded cols of w2/b2 are zero,
    # so padded lanes of h2 are exactly ReLU(0) = 0.
    h2 = jnp.dot(h1.astype(jnp.bfloat16), w2_ref[...],
                 preferred_element_type=jnp.float32)
    h2 = jnp.maximum(h2 + b2_ref[...], 0.0)
    # dropout(p=0.5): eval-mode identity.

    # Layer 3: (tb, 128-padded) @ (128-padded, outp); padded rows/cols of w3
    # and padded b3 entries are zero -> padded output lanes are zero and are
    # sliced away in the wrapper. Store lane-dense in bf16.
    out = jnp.dot(h2.astype(jnp.bfloat16), w3_ref[...],
                  preferred_element_type=jnp.float32)
    o_ref[...] = (out + b3_ref[...]).astype(o_ref.dtype)


def chatbot_forward(x, kparams, out_size):
    """x: (B, input_size) f32. kparams: padded/bf16 kernel params.
    Returns (B, out_size) f32."""
    w1, b1, w2, b2, w3, b3 = (kparams["w1"], kparams["b1"], kparams["w2"],
                              kparams["b2"], kparams["w3"], kparams["b3"])
    B, din = x.shape
    assert w1.shape[0] == din, (w1.shape, din)
    outp = w3.shape[1]      # padded output width (multiple of 128)

    tb, grid_len = _choose_batch_tiling(B)

    flops = 2 * B * (din * H1 + H1 * H2P + H2P * outp)
    bytes_accessed = (x.size * 4
                      + (w1.size + w2.size + w3.size) * 2
                      + (b1.size + b2.size + b3.size) * 4
                      + B * outp * 2)

    out_padded = pl.pallas_call(
        chatbot_mlp_kernel,
        out_shape=jax.ShapeDtypeStruct((B, outp), jnp.bfloat16),
        grid_spec=pltpu.PrefetchScalarGridSpec(
            num_scalar_prefetch=0,
            grid=(grid_len,),
            in_specs=[
                # batch tile marches with the grid; x stays unpadded f32
                pl.BlockSpec((tb, din), lambda i: (i, 0)),
                # weights / biases pinned VMEM-resident across all batch tiles
                pl.BlockSpec((din, H1), lambda i: (0, 0)),
                pl.BlockSpec((1, H1), lambda i: (0, 0)),
                pl.BlockSpec((H1, H2P), lambda i: (0, 0)),
                pl.BlockSpec((1, H2P), lambda i: (0, 0)),
                pl.BlockSpec((H2P, outp), lambda i: (0, 0)),
                pl.BlockSpec((1, outp), lambda i: (0, 0)),
            ],
            out_specs=pl.BlockSpec((tb, outp), lambda i: (i, 0)),
        ),
        compiler_params=pltpu.CompilerParams(
            dimension_semantics=("parallel",),        # megacore sharding on v7x
            vmem_limit_bytes=32 * 1024 * 1024,        # ample for tb <= 2048,
        ),                                            # within v5e/v6e/v7x budgets
        cost_estimate=pl.CostEstimate(
            flops=flops, transcendentals=0, bytes_accessed=bytes_accessed),
    )(x, w1, b1, w2, b2, w3, b3)

    # Only the tiny useful slice is upcast back to f32.
    return out_padded[:, :out_size].astype(jnp.float32)


def init_params(key, input_size, output_size):
    """Logical f32 params mirroring PyTorch nn.Linear shapes, stored
    transposed (in, out) so the kernel computes x @ W + b."""
    k1, k2, k3, k4, k5, k6 = jax.random.split(key, 6)

    def lin(kw, kb, fan_in, fan_out):
        bound = 1.0 / jnp.sqrt(jnp.float32(fan_in))
        w = jax.random.uniform(kw, (fan_in, fan_out), jnp.float32, -bound, bound)
        b = jax.random.uniform(kb, (1, fan_out), jnp.float32, -bound, bound)
        return w, b

    w1, b1 = lin(k1, k2, input_size, H1)
    w2, b2 = lin(k3, k4, H1, H2)
    w3, b3 = lin(k5, k6, H2, output_size)
    return dict(w1=w1, b1=b1, w2=w2, b2=b2, w3=w3, b3=b3)


def prepare_kernel_params(params, input_size, output_size):
    """Zero-pad narrow hidden/output dims to lane width 128 and cast weights to
    bf16. Zero padding is exact for matmul + bias + ReLU. The input dim of w1
    is left at its true width (x streams in unpadded)."""
    outp = _round_up(output_size, LANE)

    def pad_to(a, shape):
        return jnp.pad(a, tuple((0, t - s) for s, t in zip(a.shape, shape)))

    return dict(
        w1=params["w1"].astype(jnp.bfloat16),                   # (din, 128)
        b1=params["b1"],                                        # f32 (1, 128)
        w2=pad_to(params["w2"], (H1, H2P)).astype(jnp.bfloat16),
        b2=pad_to(params["b2"], (1, H2P)),                      # f32
        w3=pad_to(params["w3"], (H2P, outp)).astype(jnp.bfloat16),
        b3=pad_to(params["b3"], (1, outp)),                     # f32
    )


def reference_forward(x, params):
    h1 = jnp.maximum(x @ params["w1"] + params["b1"], 0.0)
    h2 = jnp.maximum(h1 @ params["w2"] + params["b2"], 0.0)
    return h2 @ params["w3"] + params["b3"]


if __name__ == "__main__":
    INPUT_SIZE = 32    # bag-of-words feature size
    OUTPUT_SIZE = 16   # number of intent categories
    BATCH = 8

    key = jax.random.PRNGKey(0)
    kx, kp = jax.random.split(key)
    x = jax.random.normal(kx, (BATCH, INPUT_SIZE), jnp.float32)

    params = init_params(kp, INPUT_SIZE, OUTPUT_SIZE)
    kparams = prepare_kernel_params(params, INPUT_SIZE, OUTPUT_SIZE)

    out = chatbot_forward(x, kparams, OUTPUT_SIZE)
    out = jax.block_until_ready(out)

    ref = reference_forward(x, params)
    assert out.shape == (BATCH, OUTPUT_SIZE), out.shape
    max_err = float(jnp.max(jnp.abs(out - ref)))
    # bf16 MXU inputs + bf16 output store with f32 accumulation -> relaxed
    # tolerance vs the f32 reference.
    assert jnp.allclose(out, ref, atol=5e-2, rtol=5e-2), (
        f"mismatch vs reference (max abs err {max_err})")

    print("KERNEL_OK")
</pallas_src>

<mosaic_0001>
module attributes {stable_mosaic.version = 11 : i64} {
  func.func @chatbot_mlp_kernel(%arg0: i32, %arg1: memref<8x32xf32, #tpu.memory_space<vmem>>, %arg2: memref<32x128xbf16, #tpu.memory_space<vmem>>, %arg3: memref<1x128xf32, #tpu.memory_space<vmem>>, %arg4: memref<128x128xbf16, #tpu.memory_space<vmem>>, %arg5: memref<1x128xf32, #tpu.memory_space<vmem>>, %arg6: memref<128x128xbf16, #tpu.memory_space<vmem>>, %arg7: memref<1x128xf32, #tpu.memory_space<vmem>>, %arg8: memref<8x128xbf16, #tpu.memory_space<vmem>>) attributes {dimension_semantics = [#tpu.dimension_semantics<parallel>], iteration_bounds = array<i64: 1>, scalar_prefetch = 0 : i64, scratch_operands = 0 : i64, tpu.core_type = #tpu.core_type<tc>, window_params = [{transform_indices = @transform_0, window_bounds = array<i64: 8, 32>}, {pipeline_mode = #tpu.pipeline_mode<synchronous>, transform_indices = @transform_1, window_bounds = array<i64: 32, 128>}, {pipeline_mode = #tpu.pipeline_mode<synchronous>, transform_indices = @transform_2, window_bounds = array<i64: 1, 128>}, {pipeline_mode = #tpu.pipeline_mode<synchronous>, transform_indices = @transform_3, window_bounds = array<i64: 128, 128>}, {pipeline_mode = #tpu.pipeline_mode<synchronous>, transform_indices = @transform_4, window_bounds = array<i64: 1, 128>}, {pipeline_mode = #tpu.pipeline_mode<synchronous>, transform_indices = @transform_5, window_bounds = array<i64: 128, 128>}, {pipeline_mode = #tpu.pipeline_mode<synchronous>, transform_indices = @transform_6, window_bounds = array<i64: 1, 128>}, {transform_indices = @transform_7, window_bounds = array<i64: 8, 128>}]} {
    %c0 = arith.constant 0 : index
    %c0_0 = arith.constant 0 : index
    %0 = vector.load %arg1[%c0, %c0_0] : memref<8x32xf32, #tpu.memory_space<vmem>>, vector<8x32xf32>
    %1 = arith.truncf %0 : vector<8x32xf32> to vector<8x32xbf16>
    %c0_1 = arith.constant 0 : index
    %c0_2 = arith.constant 0 : index
    %2 = vector.load %arg2[%c0_1, %c0_2] : memref<32x128xbf16, #tpu.memory_space<vmem>>, vector<32x128xbf16>
    %cst = arith.constant dense<0.000000e+00> : vector<8x128xf32>
    %3 = tpu.matmul %1, %2, %cst {dimension_numbers = #tpu.dot_dimension_numbers<[1], [0], [0], [1], [0, 0, 1, 1], [], []>} : vector<8x32xbf16>, vector<32x128xbf16>, vector<8x128xf32> -> vector<8x128xf32>
    %c0_3 = arith.constant 0 : index
    %c0_4 = arith.constant 0 : index
    %4 = vector.load %arg3[%c0_3, %c0_4] : memref<1x128xf32, #tpu.memory_space<vmem>>, vector<1x128xf32>
    %5 = vector.broadcast %4 : vector<1x128xf32> to vector<8x128xf32>
    %6 = arith.addf %3, %5 : vector<8x128xf32>
    %cst_5 = arith.constant 0.000000e+00 : f32
    %7 = vector.broadcast %cst_5 : f32 to vector<8x128xf32>
    %8 = arith.maximumf %6, %7 : vector<8x128xf32>
    %9 = arith.truncf %8 : vector<8x128xf32> to vector<8x128xbf16>
    %c0_6 = arith.constant 0 : index
    %c0_7 = arith.constant 0 : index
    %10 = vector.load %arg4[%c0_6, %c0_7] : memref<128x128xbf16, #tpu.memory_space<vmem>>, vector<128x128xbf16>
    %cst_8 = arith.constant dense<0.000000e+00> : vector<8x128xf32>
    %11 = tpu.matmul %9, %10, %cst_8 {dimension_numbers = #tpu.dot_dimension_numbers<[1], [0], [0], [1], [0, 0, 1, 1], [], []>} : vector<8x128xbf16>, vector<128x128xbf16>, vector<8x128xf32> -> vector<8x128xf32>
    %c0_9 = arith.constant 0 : index
    %c0_10 = arith.constant 0 : index
    %12 = vector.load %arg5[%c0_9, %c0_10] : memref<1x128xf32, #tpu.memory_space<vmem>>, vector<1x128xf32>
    %13 = vector.broadcast %12 : vector<1x128xf32> to vector<8x128xf32>
    %14 = arith.addf %11, %13 : vector<8x128xf32>
    %cst_11 = arith.constant 0.000000e+00 : f32
    %15 = vector.broadcast %cst_11 : f32 to vector<8x128xf32>
    %16 = arith.maximumf %14, %15 : vector<8x128xf32>
    %17 = arith.truncf %16 : vector<8x128xf32> to vector<8x128xbf16>
    %c0_12 = arith.constant 0 : index
    %c0_13 = arith.constant 0 : index
    %18 = vector.load %arg6[%c0_12, %c0_13] : memref<128x128xbf16, #tpu.memory_space<vmem>>, vector<128x128xbf16>
    %cst_14 = arith.constant dense<0.000000e+00> : vector<8x128xf32>
    %19 = tpu.matmul %17, %18, %cst_14 {dimension_numbers = #tpu.dot_dimension_numbers<[1], [0], [0], [1], [0, 0, 1, 1], [], []>} : vector<8x128xbf16>, vector<128x128xbf16>, vector<8x128xf32> -> vector<8x128xf32>
    %c0_15 = arith.constant 0 : index
    %c0_16 = arith.constant 0 : index
    %20 = vector.load %arg7[%c0_15, %c0_16] : memref<1x128xf32, #tpu.memory_space<vmem>>, vector<1x128xf32>
    %21 = vector.broadcast %20 : vector<1x128xf32> to vector<8x128xf32>
    %22 = arith.addf %19, %21 : vector<8x128xf32>
    %23 = arith.truncf %22 : vector<8x128xf32> to vector<8x128xbf16>
    %c0_17 = arith.constant 0 : index
    %c0_18 = arith.constant 0 : index
    %24 = vector.load %arg8[%c0_17, %c0_18] : memref<8x128xbf16, #tpu.memory_space<vmem>>, vector<8x128xbf16>
    tpu.vector_store %arg8[%c0_17, %c0_18], %23 {strides = array<i32>} : memref<8x128xbf16, #tpu.memory_space<vmem>>, vector<8x128xbf16>,
    return
  }
  func.func @transform_0(%arg0: i32) -> (i32, i32) {
    %c0_i32 = arith.constant 0 : i32
    %c0_i32_0 = arith.constant 0 : i32
    return %arg0, %c0_i32 : i32, i32
  }
  func.func @transform_1(%arg0: i32) -> (i32, i32) {
    %c0_i32 = arith.constant 0 : i32
    %c0_i32_0 = arith.constant 0 : i32
    %c0_i32_1 = arith.constant 0 : i32
    return %c0_i32, %c0_i32_0 : i32, i32
  }
  func.func @transform_2(%arg0: i32) -> (i32, i32) {
    %c0_i32 = arith.constant 0 : i32
    %c0_i32_0 = arith.constant 0 : i32
    %c0_i32_1 = arith.constant 0 : i32
    return %c0_i32, %c0_i32_0 : i32, i32
  }
  func.func @transform_3(%arg0: i32) -> (i32, i32) {
    %c0_i32 = arith.constant 0 : i32
    %c0_i32_0 = arith.constant 0 : i32
    %c0_i32_1 = arith.constant 0 : i32
    return %c0_i32, %c0_i32_0 : i32, i32
  }
  func.func @transform_4(%arg0: i32) -> (i32, i32) {
    %c0_i32 = arith.constant 0 : i32
    %c0_i32_0 = arith.constant 0 : i32
    %c0_i32_1 = arith.constant 0 : i32
    return %c0_i32, %c0_i32_0 : i32, i32
  }
  func.func @transform_5(%arg0: i32) -> (i32, i32) {
    %c0_i32 = arith.constant 0 : i32
    %c0_i32_0 = arith.constant 0 : i32
    %c0_i32_1 = arith.constant 0 : i32
    return %c0_i32, %c0_i32_0 : i32, i32
  }
  func.func @transform_6(%arg0: i32) -> (i32, i32) {
    %c0_i32 = arith.constant 0 : i32
    %c0_i32_0 = arith.constant 0 : i32
    %c0_i32_1 = arith.constant 0 : i32
    return %c0_i32, %c0_i32_0 : i32, i32
  }
  func.func @transform_7(%arg0: i32) -> (i32, i32) {
    %c0_i32 = arith.constant 0 : i32
    %c0_i32_0 = arith.constant 0 : i32
    return %arg0, %c0_i32 : i32, i32
  }
}

</mosaic_0001>

<bundles_post_ra>
// kernel: tpu_custom_call.1
= control target key start
LH: loop header
LB: loop body
LE: loop exit
PB: predicated region body
PF: predicated region fallthrough
CT: control target
= control target key end

     0   :  { %12 = vsyncpa [#allocation3], 0  ;;  %s615_s0 = inlined_call_operand.hbm [shape: f32[8,32], index: 0, kind: input, shape index: {}]   ;;  %s616_s1 = inlined_call_operand.hbm [shape: bf16[32,128], index: 1, kind: input, shape index: {}]   ;;  %s617_s2 = inlined_call_operand.vmem [shape: f32[1,128], index: 2, kind: input, shape index: {}]   ;;  %s618_s3 = inlined_call_operand.hbm [shape: bf16[128,128], index: 3, kind: input, shape index: {}]   ;;  %s619_s4 = inlined_call_operand.vmem [shape: f32[1,128], index: 4, kind: input, shape index: {}]   ;;  %s620_s5 = inlined_call_operand.hbm [shape: bf16[128,128], index: 5, kind: input, shape index: {}]   ;;  %s621_s6 = inlined_call_operand.vmem [shape: f32[1,128], index: 6, kind: input, shape index: {}]   ;;  %s622_s7 = inlined_call_operand.hbm [shape: bf16[8,128], index: 7, kind: output, shape index: {}]  }
   0x1   :  { %13 = vsyncpa [#allocation6], 0 }
   0x2   :  { %14 = vsyncpa [#allocation9], 0  ;;  %s31_s26 = sshll.u32 %s616_s1, 4  ;;  %s32_s26 = int_to_ptr.hbm [resolvable:$true] %s31_s26 }
   0x3   :  { %15 = vsyncpa [#allocation4], 0  ;;  %s544_s27 = smov [#allocation5]   ;;  %s21_s8 = sshll.u32 %s615_s0, 4  ;;  %s22_s8 = int_to_ptr.hbm [resolvable:$true] %s21_s8 }
   0x4   :  { %s33_s28 = sshll.u32 %s544_s27, 4  ;;  %s545_s9 = smov 64   ;;  %s34_s28 = int_to_ptr.vmem [resolvable:$true] %s33_s28 }
   0x5   :  { %s546_s10 = smov 4   ;;  %s547_s11 = smov [#allocation2]  }
   0x6   :  { %39 = dma.hbm_to_vmem [thread:$0]  %s32_s26, 256, %s34_s28, [#allocation6], %s545_s9, %s545_s9, %s546_s10  }
   0x7   :  { %s23_s12 = sshll.u32 %s547_s11, 4  ;;  %s46_s15 = sshll.u32 %s618_s3, 4  ;;  %s24_s12 = int_to_ptr.vmem [resolvable:$true] %s23_s12  ;;  %s47_s15 = int_to_ptr.hbm [resolvable:$true] %s46_s15 }
   0x8   :  { %26 = dma.hbm_to_vmem [thread:$0]  %s22_s8, 128, %s24_s12, [#allocation3]  }
   0x9   :  { %s61_s17 = sshll.u32 %s620_s5, 4  ;;  %s548_s18 = smov [#allocation7]   ;;  %s62_s17 = int_to_ptr.hbm [resolvable:$true] %s61_s17 }
   0xa   :  { %s48_s19 = sshll.u32 %s548_s18, 4  ;;  %s549_s0 = smov [#allocation8]   ;;  %s49_s19 = int_to_ptr.vmem [resolvable:$true] %s48_s19 }
   0xb   :  { %54 = dma.hbm_to_vmem [thread:$0]  %s47_s15, 1024, %s49_s19, [#allocation6], %s545_s9, %s545_s9, %s546_s10  }
   0xc   :  { %s63_s20 = sshll.u32 %s549_s0, 4  ;;  %s64_s20 = int_to_ptr.vmem [resolvable:$true] %s63_s20 }
   0xd   :  { %69 = dma.hbm_to_vmem [thread:$0]  %s62_s17, 1024, %s64_s20, [#allocation9], %s545_s9, %s545_s9, %s546_s10  }
   0xe   :  { %536 = dma.done.wait [#allocation3], 128  }
   0xf   :  { %537 = vsyncadd [#allocation3], 4294967168 }
  0x10   :  { %538 = dma.done.wait [#allocation6], 1280  }
  0x11   :  { %539 = vsyncadd [#allocation6], 4294966016 }
  0x12   :  { %540 = dma.done.wait [#allocation9], 1024  }
  0x13   :  { %541 = vsyncadd [#allocation9], 4294966272  ;;  %v389_v0 = vld [vmem:[#allocation5 + $0x8] sm:$0xff]  ;;  %v388_v2 = vld [vmem:[#allocation5] sm:$0xff]  ;;  %vm111_vm0 = vcmask 261120   ;;  %s550_s24 = smov [#allocation10]  }
  0x14   :  { %v397_v1 = vld [vmem:[#allocation7 + $0x38] sm:$0xff]  ;;  %121 = vmatpush.bf16.msra.mxu0 %v389_v0  ;;  %v89_v3 = vld [vmem:[#allocation2] sm:$0xff]  ;;  %v396_v4 = vld [vmem:[#allocation7 + $0x30] sm:$0xff]  ;;  %s301_s25 = sshll.u32 %s550_s24, 4  ;;  %s303_s28 = sshll.u32 %s622_s7, 4  ;;  %s302_s25 = int_to_ptr.vmem [resolvable:$true] %s301_s25  ;;  %s304_s28 = int_to_ptr.hbm [resolvable:$true] %s303_s28 }
  0x15   :  { %198 = vmatpush.bf16.msra.mxu1 %v397_v1  ;;  %v90_v5 = vpack.c.bf16 %v89_v3, %v89_v3  ;;  %v395_v6 = vld [vmem:[#allocation7 + $0x28] sm:$0xff]  ;;  %v394_v7 = vld [vmem:[#allocation7 + $0x20] sm:$0xff]  ;;  %v393_v8 = vld [vmem:[#allocation7 + $0x18] sm:$0xff] }
  0x16   :  { %v392_v9 = vld [vmem:[#allocation7 + $0x10] sm:$0xff]  ;;  %v391_v10 = vld [vmem:[#allocation7 + $0x8] sm:$0xff]  ;;  %v390_v11 = vld [vmem:[#allocation7] sm:$0xff] }
  0x17   :  { %v405_v12 = vld [vmem:[#allocation8 + $0x38] sm:$0xff]  ;;  %v404_v13 = vld [vmem:[#allocation8 + $0x30] sm:$0xff]  ;;  %v403_v14 = vld [vmem:[#allocation8 + $0x28] sm:$0xff] }
  0x18   :  { %122 = vmatpush.bf16.msra.mxu0 %v388_v2  ;;  %281 = vmatpush.bf16.msra.mxu2 %v405_v12  ;;  %v402_v15 = vld [vmem:[#allocation8 + $0x20] sm:$0xff]  ;;  %v401_v16 = vld [vmem:[#allocation8 + $0x18] sm:$0xff]  ;;  %v400_v17 = vld [vmem:[#allocation8 + $0x10] sm:$0xff] }
  0x19   :  { %199 = vmatpush.bf16.msra.mxu1 %v396_v4  ;;  %v413_v18 = vld [vmem:[%s617_s2] ss:$0 sm:$0xff]  ;;  %v398_v25 = vld [vmem:[#allocation8] sm:$0xff] }
  0x1a   :  { %v399_v24 = vld [vmem:[#allocation8 + $0x8] sm:$0xff] }
  0x1b   :  { %323 = vmatmul.msk.bf16.vlgmr.msra.gmra.mxu0 %vm111_vm0, %v90_v5  ;;  %v414_v26 = vld [vmem:[%s619_s4] ss:$0 sm:$0xff] }
  0x1c   :  { %282 = vmatpush.bf16.msra.mxu2 %v404_v13  ;;  %v415_v32 = vld [vmem:[%s621_s6] ss:$0 sm:$0xff] }
  0x1d   :  { %200 = vmatpush.bf16.msra.mxu1 %v395_v6 }
  0x20   :  { %283 = vmatpush.bf16.msra.mxu2 %v403_v14 }
  0x21   :  { %201 = vmatpush.bf16.msra.mxu1 %v394_v7 }
  0x24   :  { %284 = vmatpush.bf16.msra.mxu2 %v402_v15 }
  0x25   :  { %202 = vmatpush.bf16.msra.mxu1 %v393_v8 }
  0x28   :  { %285 = vmatpush.bf16.msra.mxu2 %v401_v16 }
  0x29   :  { %203 = vmatpush.bf16.msra.mxu1 %v392_v9 }
  0x2c   :  { %286 = vmatpush.bf16.msra.mxu2 %v400_v17 }
  0x2d   :  { %204 = vmatpush.bf16.msra.mxu1 %v391_v10 }
  0x30   :  { %287 = vmatpush.bf16.msra.mxu2 %v399_v24 }
  0x31   :  { %205 = vmatpush.bf16.msra.mxu1 %v390_v11 }
  0x34   :  { %288 = vmatpush.bf16.msra.mxu2 %v398_v25 }
  0x98   :  { %v124_v19 = vpop.f32.mrf.mxu0 }
  0x99   :  { %v125_v20 = vadd.f32 %v413_v18, %v124_v19 }
  0x9b   :  { %v128_v21 = vmax.f32 %v125_v20, 0.0 }
  0x9d   :  { %v129_v22 = vpack.c.bf16 %v128_v21, %v128_v21 }
  0x9f   :  { %206 = vmatmul.bf16.vlgmr.msra.gmra.mxu1 %v129_v22 }
  0xa0   :  { %v126_v23 = vpop.f32.mrf.mxu0 }
 0x11c   :  { %v207_v27 = vpop.f32.mrf.mxu1 }
 0x11d   :  { %v208_v28 = vadd.f32 %v414_v26, %v207_v27 }
 0x11f   :  { %v211_v29 = vmax.f32 %v208_v28, 0.0 }
 0x121   :  { %v212_v30 = vpack.c.bf16 %v211_v29, %v211_v29 }
 0x123   :  { %289 = vmatmul.bf16.vlgmr.msra.gmra.mxu2 %v212_v30 }
 0x124   :  { %v209_v31 = vpop.f32.mrf.mxu1 }
 0x1a6   :  { %v290_v33 = vpop.f32.mrf.mxu2 }
 0x1a7   :  { %v291_v34 = vadd.f32 %v415_v32, %v290_v33 }
 0x1a9   :  { %v294_v35 = vpack.c.bf16 %v291_v34, %v291_v34 }
 0x1ab   :  { %295 = vst [vmem:[#allocation10] sm:$0xf] %v294_v35 }
 0x1ac   :  { %306 = dma.vmem_to_hbm [thread:$0]  %s302_s25, 64, %s304_s28, [#allocation4]  }
 0x1ae   :  { %v292_v36 = vpop.f32.mrf.mxu2 }
 0x1af   :  { %542 = dma.done.wait [#allocation4], 64  }
 0x1b0   :  { %543 = vsyncadd [#allocation4], 4294967232 }
 0x1b1   :  { %311 = vsyncpa [#allocation3], 1 }
 0x1b2   :  { %312 = vsyncpa [#allocation6], 1 }
 0x1b3   :  { %313 = vsyncpa [#allocation9], 1 }
 0x1b4   :  { %314 = vsyncpa [#allocation4], 1 }

</bundles_post_ra>
